<compile_context>
chip_gen: v7x
topology: tpu7x:2x2x1
jax: 0.10.0
libtpu: 0.0.40
codegen_flags: <defaults>
</compile_context>

<pallas_src>
import functools
import re

import jax
import jax.numpy as jnp
from jax.experimental import pallas as pl
from jax.experimental.pallas import tpu as pltpu


def _roll_flat(a, shift):
    """Static roll along the last (flattened H*W) axis (jnp.roll semantics)."""
    n = a.shape[-1]
    shift = shift % n
    if shift == 0:
        return a
    return pltpu.roll(a, shift=shift, axis=a.ndim - 1)


def spatial_attention_kernel(x_ref, w_ref, colmask_ref, o_ref, *,
                             C, HW, W, mul_in_input_dtype):
    # x_ref / o_ref: (bt, C*HW)  lane-dense blocks (channel-major along lanes)
    # w_ref:         (18,) SMEM  [0:9] avg taps (1/C pre-folded), [9:18] max taps
    # colmask_ref:   (3, HW)     column-validity masks (resident, constant map)
    bt = x_ref.shape[0]

    # ---- channel pooling: sum (1/C folded into weights) + running max ----
    x0 = x_ref[:, 0:HW].astype(jnp.float32)
    s = x0
    m = x0
    for c in range(1, C):
        xc = x_ref[:, c * HW:(c + 1) * HW].astype(jnp.float32)
        s = s + xc
        m = jnp.maximum(m, xc)

    # ---- 3x3 SAME conv (no bias) on the flat H*W axis: roll + boundary masks ----
    cm = colmask_ref[...]                                     # (3, HW)
    flat = jax.lax.broadcasted_iota(jnp.int32, (1, HW), 1)
    not_top = flat >= W                                       # source row r-1 valid
    not_bot = flat < (HW - W)                                 # source row r+1 valid

    acc = jnp.zeros((bt, HW), jnp.float32)
    for di in range(3):
        group = None
        for dj in range(3):
            d = (di - 1) * W + (dj - 1)
            # roll is linear: roll(w_a*sum + w_m*max) == w_a*roll(sum) + w_m*roll(max)
            tap = _roll_flat(
                w_ref[di * 3 + dj] * s + w_ref[9 + di * 3 + dj] * m, -d)
            tap = tap * cm[dj:dj + 1]                         # column boundary mask
            group = tap if group is None else group + tap
        if di == 0:                                           # one row mask per di group
            group = jnp.where(not_top, group, 0.0)
        elif di == 2:
            group = jnp.where(not_bot, group, 0.0)
        acc = acc + group

    scale = jax.nn.sigmoid(acc)                               # (bt, HW) f32

    # ---- rescale per channel; lane-dense stores into the (bt, C*HW) block ----
    if mul_in_input_dtype:
        scale_x = scale.astype(o_ref.dtype)
        for c in range(C):
            sl = slice(c * HW, (c + 1) * HW)
            o_ref[:, sl] = x_ref[:, sl] * scale_x
    else:
        for c in range(C):
            sl = slice(c * HW, (c + 1) * HW)
            o_ref[:, sl] = (x_ref[:, sl].astype(jnp.float32) * scale).astype(o_ref.dtype)


def _tpu_generation():
    """Best-effort TPU generation (5/6/7...) from device_kind; default 6."""
    try:
        kind = jax.devices()[0].device_kind
    except Exception:
        return 6
    m = re.search(r"v(\d+)", str(kind).lower())
    return int(m.group(1)) if m else 6


def _pick_block_batch(B, row_bytes, hw, sublane, vmem_limit, two_tc):
    """Largest batch tile (divisor of B; sublane-aligned unless == B) whose
    pipeline residency fits the scoped-VMEM budget.  Splits only when needed,
    or on 2-TC parts when each step still carries >= 512 KiB of work."""

    def padded_rows(bt):
        return -(-bt // sublane) * sublane

    def block_bytes(bt):
        return padded_rows(bt) * row_bytes        # one (bt, C*HW) buffer

    def resident_bytes(bt):
        temps = 4 * padded_rows(bt) * hw * 4      # s, m, acc, scale (f32)
        return 4 * block_bytes(bt) + temps        # in+out, double-buffered

    budget = int(vmem_limit * 0.75)
    candidates = [bt for bt in range(1, B + 1)
                  if B % bt == 0 and (bt == B or bt % sublane == 0)]
    if not candidates:
        candidates = [B]
    fitting = [bt for bt in candidates if resident_bytes(bt) <= budget]
    # TODO(synk): if even the smallest candidate overflows VMEM, tile C or H*W
    # (the conv would need halo handling); we fall back to the smallest tile.
    bt = max(fitting) if fitting else min(candidates)

    if two_tc and bt == B and B >= 2:
        splits = [c for c in candidates
                  if c < B and B // c >= 2 and block_bytes(c) >= (512 << 10)]
        if splits:
            bt = max(splits)
    return bt


def spatial_attention(x, w, *, block_batch=None):
    """x: (B, C, H, W); w: (1, 2, 3, 3) OIHW Conv2d(2, 1, 3, bias=False) weight."""
    B, C, H, W = x.shape
    HW = H * W

    gen = _tpu_generation()
    two_tc = gen >= 7
    # v7x: 64 MiB physical VMEM per TC -> stay well inside it; v5e/v6e: 128 MiB.
    vmem_limit = (32 << 20) if gen >= 7 else (64 << 20)

    # Lane-dense layout: (B, C*HW), free contiguous reshape.
    x_flat = x.reshape(B, C * HW)

    # Flat SMEM weight; fold 1/C into the avg-branch taps (mean == weighted sum).
    w32 = w.astype(jnp.float32)
    w_flat = jnp.concatenate([w32[0, 0].reshape(9) / C, w32[0, 1].reshape(9)])

    # Precomputed 0/1 column-boundary masks for the three horizontal taps.
    col = jnp.arange(HW, dtype=jnp.int32) % W
    colmask = jnp.stack([
        (col >= 1).astype(jnp.float32),          # dj = 0 (needs left neighbour)
        jnp.ones((HW,), jnp.float32),            # dj = 1
        (col <= W - 2).astype(jnp.float32),      # dj = 2 (needs right neighbour)
    ])                                           # (3, HW)

    itemsize = jnp.dtype(x.dtype).itemsize
    sublane = (8 * 4) // itemsize                # 8 (f32) / 16 (bf16) / 32 (int8)
    if block_batch is None:
        block_batch = _pick_block_batch(B, C * HW * itemsize, HW, sublane,
                                        vmem_limit, two_tc)
    bt = block_batch
    assert B % bt == 0, "block_batch must divide the batch"
    grid = (B // bt,)

    # bf16 VALU exists on v6e/v7x; keep f32 rescale math on v5e.
    mul_in_input_dtype = (x.dtype == jnp.float32) or (
        x.dtype == jnp.bfloat16 and gen >= 6)

    kernel = functools.partial(spatial_attention_kernel, C=C, HW=HW, W=W,
                               mul_in_input_dtype=mul_in_input_dtype)
    out_flat = pl.pallas_call(
        kernel,
        out_shape=jax.ShapeDtypeStruct((B, C * HW), x.dtype),
        grid=grid,
        in_specs=[
            pl.BlockSpec((bt, C * HW), lambda b: (b, 0)),
            pl.BlockSpec(memory_space=pltpu.MemorySpace.SMEM),
            pl.BlockSpec((3, HW), lambda b: (0, 0)),
        ],
        out_specs=pl.BlockSpec((bt, C * HW), lambda b: (b, 0)),
        compiler_params=pltpu.CompilerParams(
            dimension_semantics=("parallel",),
            vmem_limit_bytes=vmem_limit,
        ),
    )(x_flat, w_flat, colmask)
    return out_flat.reshape(B, C, H, W)


def spatial_attention_reference(x, w):
    """Pure-JAX reference matching the PyTorch module semantics."""
    avg = jnp.mean(x, axis=1, keepdims=True)
    mx = jnp.max(x, axis=1, keepdims=True)
    pooled = jnp.concatenate([avg, mx], axis=1)
    conv = jax.lax.conv_general_dilated(
        pooled, w, window_strides=(1, 1), padding="SAME",
        dimension_numbers=("NCHW", "OIHW", "NCHW"))
    return x * jax.nn.sigmoid(conv)


if __name__ == "__main__":
    key = jax.random.PRNGKey(0)
    kx, kw = jax.random.split(key)

    # Small shapes consistent with the module: batch=2, channels=4, 16x16 spatial.
    x = jax.random.normal(kx, (2, 4, 16, 16), dtype=jnp.float32)
    # Deterministic synthetic Conv2d(2, 1, 3, bias=False) weight, OIHW.
    w = 0.1 * jax.random.normal(kw, (1, 2, 3, 3), dtype=jnp.float32)

    out = jax.block_until_ready(spatial_attention(x, w))

    ref = spatial_attention_reference(x, w)
    max_err = float(jnp.max(jnp.abs(out - ref)))
    assert max_err < 1e-4, f"mismatch vs reference: max_err={max_err}"

    print("KERNEL_OK")
</pallas_src>

<mosaic_0001>
module attributes {stable_mosaic.version = 11 : i64} {
  func.func @spatial_attention_kernel(%arg0: i32, %arg1: memref<2x1024xf32, #tpu.memory_space<vmem>>, %arg2: memref<18xf32, #tpu.memory_space<smem>>, %arg3: memref<3x256xf32, #tpu.memory_space<vmem>>, %arg4: memref<2x1024xf32, #tpu.memory_space<vmem>>) attributes {dimension_semantics = [#tpu.dimension_semantics<parallel>], iteration_bounds = array<i64: 1>, scalar_prefetch = 0 : i64, scratch_operands = 0 : i64, tpu.core_type = #tpu.core_type<tc>, window_params = [{transform_indices = @transform_0, window_bounds = array<i64: 2, 1024>}, {transform_indices = @transform_1, window_bounds = array<i64: 18>}, {pipeline_mode = #tpu.pipeline_mode<synchronous>, transform_indices = @transform_2, window_bounds = array<i64: 3, 256>}, {transform_indices = @transform_3, window_bounds = array<i64: 2, 1024>}]} {
    %c0 = arith.constant 0 : index
    %c0_0 = arith.constant 0 : index
    %0 = vector.load %arg1[%c0, %c0_0] : memref<2x1024xf32, #tpu.memory_space<vmem>>, vector<2x256xf32>
    %c0_1 = arith.constant 0 : index
    %c256 = arith.constant 256 : index
    %1 = vector.load %arg1[%c0_1, %c256] : memref<2x1024xf32, #tpu.memory_space<vmem>>, vector<2x256xf32>
    %2 = arith.addf %0, %1 : vector<2x256xf32>
    %3 = arith.maximumf %0, %1 : vector<2x256xf32>
    %c0_2 = arith.constant 0 : index
    %c512 = arith.constant 512 : index
    %4 = vector.load %arg1[%c0_2, %c512] : memref<2x1024xf32, #tpu.memory_space<vmem>>, vector<2x256xf32>
    %5 = arith.addf %2, %4 : vector<2x256xf32>
    %6 = arith.maximumf %3, %4 : vector<2x256xf32>
    %c0_3 = arith.constant 0 : index
    %c768 = arith.constant 768 : index
    %7 = vector.load %arg1[%c0_3, %c768] : memref<2x1024xf32, #tpu.memory_space<vmem>>, vector<2x256xf32>
    %8 = arith.addf %5, %7 : vector<2x256xf32>
    %9 = arith.maximumf %6, %7 : vector<2x256xf32>
    %c0_4 = arith.constant 0 : index
    %c0_5 = arith.constant 0 : index
    %10 = vector.load %arg3[%c0_4, %c0_5] : memref<3x256xf32, #tpu.memory_space<vmem>>, vector<3x256xf32>
    %11 = tpu.iota {dimensions = array<i32: 1>} : vector<1x256xi32>
    %c16_i32 = arith.constant 16 : i32
    %12 = vector.broadcast %c16_i32 : i32 to vector<1x256xi32>
    %13 = arith.cmpi sge, %11, %12 : vector<1x256xi32>
    %c240_i32 = arith.constant 240 : i32
    %14 = vector.broadcast %c240_i32 : i32 to vector<1x256xi32>
    %15 = arith.cmpi slt, %11, %14 : vector<1x256xi32>
    %cst = arith.constant 0.000000e+00 : f32
    %16 = vector.broadcast %cst : f32 to vector<2x256xf32>
    %c0_6 = arith.constant 0 : index
    %17 = memref.load %arg2[%c0_6] : memref<18xf32, #tpu.memory_space<smem>>
    %18 = vector.broadcast %17 : f32 to vector<2x256xf32>
    %19 = arith.mulf %18, %8 : vector<2x256xf32>
    %c9 = arith.constant 9 : index
    %20 = memref.load %arg2[%c9] : memref<18xf32, #tpu.memory_space<smem>>
    %21 = vector.broadcast %20 : f32 to vector<2x256xf32>
    %22 = arith.mulf %21, %9 : vector<2x256xf32>
    %23 = arith.addf %19, %22 : vector<2x256xf32>
    %c17_i32 = arith.constant 17 : i32
    %24 = tpu.dynamic_rotate %23 by %c17_i32 dim 1 : vector<2x256xf32>, i32 -> vector<2x256xf32>
    %25 = vector.extract_strided_slice %10 {offsets = [0, 0], sizes = [1, 256], strides = [1, 1]} : vector<3x256xf32> to vector<1x256xf32>
    %26 = vector.broadcast %25 : vector<1x256xf32> to vector<2x256xf32>
    %27 = arith.mulf %24, %26 : vector<2x256xf32>
    %c1 = arith.constant 1 : index
    %28 = memref.load %arg2[%c1] : memref<18xf32, #tpu.memory_space<smem>>
    %29 = vector.broadcast %28 : f32 to vector<2x256xf32>
    %30 = arith.mulf %29, %8 : vector<2x256xf32>
    %c10 = arith.constant 10 : index
    %31 = memref.load %arg2[%c10] : memref<18xf32, #tpu.memory_space<smem>>
    %32 = vector.broadcast %31 : f32 to vector<2x256xf32>
    %33 = arith.mulf %32, %9 : vector<2x256xf32>
    %34 = arith.addf %30, %33 : vector<2x256xf32>
    %c16_i32_7 = arith.constant 16 : i32
    %35 = tpu.dynamic_rotate %34 by %c16_i32_7 dim 1 : vector<2x256xf32>, i32 -> vector<2x256xf32>
    %36 = vector.extract_strided_slice %10 {offsets = [1, 0], sizes = [1, 256], strides = [1, 1]} : vector<3x256xf32> to vector<1x256xf32>
    %37 = vector.broadcast %36 : vector<1x256xf32> to vector<2x256xf32>
    %38 = arith.mulf %35, %37 : vector<2x256xf32>
    %39 = arith.addf %27, %38 : vector<2x256xf32>
    %c2 = arith.constant 2 : index
    %40 = memref.load %arg2[%c2] : memref<18xf32, #tpu.memory_space<smem>>
    %41 = vector.broadcast %40 : f32 to vector<2x256xf32>
    %42 = arith.mulf %41, %8 : vector<2x256xf32>
    %c11 = arith.constant 11 : index
    %43 = memref.load %arg2[%c11] : memref<18xf32, #tpu.memory_space<smem>>
    %44 = vector.broadcast %43 : f32 to vector<2x256xf32>
    %45 = arith.mulf %44, %9 : vector<2x256xf32>
    %46 = arith.addf %42, %45 : vector<2x256xf32>
    %c15_i32 = arith.constant 15 : i32
    %47 = tpu.dynamic_rotate %46 by %c15_i32 dim 1 : vector<2x256xf32>, i32 -> vector<2x256xf32>
    %48 = vector.extract_strided_slice %10 {offsets = [2, 0], sizes = [1, 256], strides = [1, 1]} : vector<3x256xf32> to vector<1x256xf32>
    %49 = vector.broadcast %48 : vector<1x256xf32> to vector<2x256xf32>
    %50 = arith.mulf %47, %49 : vector<2x256xf32>
    %51 = arith.addf %39, %50 : vector<2x256xf32>
    %cst_8 = arith.constant 0.000000e+00 : f32
    %52 = vector.shape_cast %13 : vector<1x256xi1> to vector<1x256xi1>
    %53 = vector.broadcast %52 : vector<1x256xi1> to vector<2x256xi1>
    %54 = vector.broadcast %cst_8 : f32 to vector<2x256xf32>
    %55 = arith.select %53, %51, %54 : vector<2x256xi1>, vector<2x256xf32>
    %56 = arith.addf %16, %55 : vector<2x256xf32>
    %c3 = arith.constant 3 : index
    %57 = memref.load %arg2[%c3] : memref<18xf32, #tpu.memory_space<smem>>
    %58 = vector.broadcast %57 : f32 to vector<2x256xf32>
    %59 = arith.mulf %58, %8 : vector<2x256xf32>
    %c12 = arith.constant 12 : index
    %60 = memref.load %arg2[%c12] : memref<18xf32, #tpu.memory_space<smem>>
    %61 = vector.broadcast %60 : f32 to vector<2x256xf32>
    %62 = arith.mulf %61, %9 : vector<2x256xf32>
    %63 = arith.addf %59, %62 : vector<2x256xf32>
    %c1_i32 = arith.constant 1 : i32
    %64 = tpu.dynamic_rotate %63 by %c1_i32 dim 1 : vector<2x256xf32>, i32 -> vector<2x256xf32>
    %65 = vector.extract_strided_slice %10 {offsets = [0, 0], sizes = [1, 256], strides = [1, 1]} : vector<3x256xf32> to vector<1x256xf32>
    %66 = vector.broadcast %65 : vector<1x256xf32> to vector<2x256xf32>
    %67 = arith.mulf %64, %66 : vector<2x256xf32>
    %c4 = arith.constant 4 : index
    %68 = memref.load %arg2[%c4] : memref<18xf32, #tpu.memory_space<smem>>
    %69 = vector.broadcast %68 : f32 to vector<2x256xf32>
    %70 = arith.mulf %69, %8 : vector<2x256xf32>
    %c13 = arith.constant 13 : index
    %71 = memref.load %arg2[%c13] : memref<18xf32, #tpu.memory_space<smem>>
    %72 = vector.broadcast %71 : f32 to vector<2x256xf32>
    %73 = arith.mulf %72, %9 : vector<2x256xf32>
    %74 = arith.addf %70, %73 : vector<2x256xf32>
    %75 = vector.extract_strided_slice %10 {offsets = [1, 0], sizes = [1, 256], strides = [1, 1]} : vector<3x256xf32> to vector<1x256xf32>
    %76 = vector.broadcast %75 : vector<1x256xf32> to vector<2x256xf32>
    %77 = arith.mulf %74, %76 : vector<2x256xf32>
    %78 = arith.addf %67, %77 : vector<2x256xf32>
    %c5 = arith.constant 5 : index
    %79 = memref.load %arg2[%c5] : memref<18xf32, #tpu.memory_space<smem>>
    %80 = vector.broadcast %79 : f32 to vector<2x256xf32>
    %81 = arith.mulf %80, %8 : vector<2x256xf32>
    %c14 = arith.constant 14 : index
    %82 = memref.load %arg2[%c14] : memref<18xf32, #tpu.memory_space<smem>>
    %83 = vector.broadcast %82 : f32 to vector<2x256xf32>
    %84 = arith.mulf %83, %9 : vector<2x256xf32>
    %85 = arith.addf %81, %84 : vector<2x256xf32>
    %c255_i32 = arith.constant 255 : i32
    %86 = tpu.dynamic_rotate %85 by %c255_i32 dim 1 : vector<2x256xf32>, i32 -> vector<2x256xf32>
    %87 = vector.extract_strided_slice %10 {offsets = [2, 0], sizes = [1, 256], strides = [1, 1]} : vector<3x256xf32> to vector<1x256xf32>
    %88 = vector.broadcast %87 : vector<1x256xf32> to vector<2x256xf32>
    %89 = arith.mulf %86, %88 : vector<2x256xf32>
    %90 = arith.addf %78, %89 : vector<2x256xf32>
    %91 = arith.addf %56, %90 : vector<2x256xf32>
    %c6 = arith.constant 6 : index
    %92 = memref.load %arg2[%c6] : memref<18xf32, #tpu.memory_space<smem>>
    %93 = vector.broadcast %92 : f32 to vector<2x256xf32>
    %94 = arith.mulf %93, %8 : vector<2x256xf32>
    %c15 = arith.constant 15 : index
    %95 = memref.load %arg2[%c15] : memref<18xf32, #tpu.memory_space<smem>>
    %96 = vector.broadcast %95 : f32 to vector<2x256xf32>
    %97 = arith.mulf %96, %9 : vector<2x256xf32>
    %98 = arith.addf %94, %97 : vector<2x256xf32>
    %c241_i32 = arith.constant 241 : i32
    %99 = tpu.dynamic_rotate %98 by %c241_i32 dim 1 : vector<2x256xf32>, i32 -> vector<2x256xf32>
    %100 = vector.extract_strided_slice %10 {offsets = [0, 0], sizes = [1, 256], strides = [1, 1]} : vector<3x256xf32> to vector<1x256xf32>
    %101 = vector.broadcast %100 : vector<1x256xf32> to vector<2x256xf32>
    %102 = arith.mulf %99, %101 : vector<2x256xf32>
    %c7 = arith.constant 7 : index
    %103 = memref.load %arg2[%c7] : memref<18xf32, #tpu.memory_space<smem>>
    %104 = vector.broadcast %103 : f32 to vector<2x256xf32>
    %105 = arith.mulf %104, %8 : vector<2x256xf32>
    %c16 = arith.constant 16 : index
    %106 = memref.load %arg2[%c16] : memref<18xf32, #tpu.memory_space<smem>>
    %107 = vector.broadcast %106 : f32 to vector<2x256xf32>
    %108 = arith.mulf %107, %9 : vector<2x256xf32>
    %109 = arith.addf %105, %108 : vector<2x256xf32>
    %c240_i32_9 = arith.constant 240 : i32
    %110 = tpu.dynamic_rotate %109 by %c240_i32_9 dim 1 : vector<2x256xf32>, i32 -> vector<2x256xf32>
    %111 = vector.extract_strided_slice %10 {offsets = [1, 0], sizes = [1, 256], strides = [1, 1]} : vector<3x256xf32> to vector<1x256xf32>
    %112 = vector.broadcast %111 : vector<1x256xf32> to vector<2x256xf32>
    %113 = arith.mulf %110, %112 : vector<2x256xf32>
    %114 = arith.addf %102, %113 : vector<2x256xf32>
    %c8 = arith.constant 8 : index
    %115 = memref.load %arg2[%c8] : memref<18xf32, #tpu.memory_space<smem>>
    %116 = vector.broadcast %115 : f32 to vector<2x256xf32>
    %117 = arith.mulf %116, %8 : vector<2x256xf32>
    %c17 = arith.constant 17 : index
    %118 = memref.load %arg2[%c17] : memref<18xf32, #tpu.memory_space<smem>>
    %119 = vector.broadcast %118 : f32 to vector<2x256xf32>
    %120 = arith.mulf %119, %9 : vector<2x256xf32>
    %121 = arith.addf %117, %120 : vector<2x256xf32>
    %c239_i32 = arith.constant 239 : i32
    %122 = tpu.dynamic_rotate %121 by %c239_i32 dim 1 : vector<2x256xf32>, i32 -> vector<2x256xf32>
    %123 = vector.extract_strided_slice %10 {offsets = [2, 0], sizes = [1, 256], strides = [1, 1]} : vector<3x256xf32> to vector<1x256xf32>
    %124 = vector.broadcast %123 : vector<1x256xf32> to vector<2x256xf32>
    %125 = arith.mulf %122, %124 : vector<2x256xf32>
    %126 = arith.addf %114, %125 : vector<2x256xf32>
    %cst_10 = arith.constant 0.000000e+00 : f32
    %127 = vector.shape_cast %15 : vector<1x256xi1> to vector<1x256xi1>
    %128 = vector.broadcast %127 : vector<1x256xi1> to vector<2x256xi1>
    %129 = vector.broadcast %cst_10 : f32 to vector<2x256xf32>
    %130 = arith.select %128, %126, %129 : vector<2x256xi1>, vector<2x256xf32>
    %131 = arith.addf %91, %130 : vector<2x256xf32>
    %132 = arith.negf %131 : vector<2x256xf32>
    %133 = math.exp %132 : vector<2x256xf32>
    %cst_11 = arith.constant 1.000000e+00 : f32
    %134 = vector.broadcast %cst_11 : f32 to vector<2x256xf32>
    %135 = arith.addf %134, %133 : vector<2x256xf32>
    %136 = arith.divf %134, %135 : vector<2x256xf32>
    %c0_12 = arith.constant 0 : index
    %c0_13 = arith.constant 0 : index
    %137 = vector.load %arg1[%c0_12, %c0_13] : memref<2x1024xf32, #tpu.memory_space<vmem>>, vector<2x256xf32>
    %138 = arith.mulf %137, %136 : vector<2x256xf32>
    %c0_14 = arith.constant 0 : index
    %c0_15 = arith.constant 0 : index
    %139 = vector.load %arg4[%c0_14, %c0_15] : memref<2x1024xf32, #tpu.memory_space<vmem>>, vector<2x256xf32>
    tpu.vector_store %arg4[%c0_14, %c0_15], %138 {strides = array<i32>} : memref<2x1024xf32, #tpu.memory_space<vmem>>, vector<2x256xf32>,
    %c0_16 = arith.constant 0 : index
    %c256_17 = arith.constant 256 : index
    %140 = vector.load %arg1[%c0_16, %c256_17] : memref<2x1024xf32, #tpu.memory_space<vmem>>, vector<2x256xf32>
    %141 = arith.mulf %140, %136 : vector<2x256xf32>
    %c0_18 = arith.constant 0 : index
    %c256_19 = arith.constant 256 : index
    %142 = vector.load %arg4[%c0_18, %c256_19] : memref<2x1024xf32, #tpu.memory_space<vmem>>, vector<2x256xf32>
    tpu.vector_store %arg4[%c0_18, %c256_19], %141 {strides = array<i32>} : memref<2x1024xf32, #tpu.memory_space<vmem>>, vector<2x256xf32>,
    %c0_20 = arith.constant 0 : index
    %c512_21 = arith.constant 512 : index
    %143 = vector.load %arg1[%c0_20, %c512_21] : memref<2x1024xf32, #tpu.memory_space<vmem>>, vector<2x256xf32>
    %144 = arith.mulf %143, %136 : vector<2x256xf32>
    %c0_22 = arith.constant 0 : index
    %c512_23 = arith.constant 512 : index
    %145 = vector.load %arg4[%c0_22, %c512_23] : memref<2x1024xf32, #tpu.memory_space<vmem>>, vector<2x256xf32>
    tpu.vector_store %arg4[%c0_22, %c512_23], %144 {strides = array<i32>} : memref<2x1024xf32, #tpu.memory_space<vmem>>, vector<2x256xf32>,
    %c0_24 = arith.constant 0 : index
    %c768_25 = arith.constant 768 : index
    %146 = vector.load %arg1[%c0_24, %c768_25] : memref<2x1024xf32, #tpu.memory_space<vmem>>, vector<2x256xf32>
    %147 = arith.mulf %146, %136 : vector<2x256xf32>
    %c0_26 = arith.constant 0 : index
    %c768_27 = arith.constant 768 : index
    %148 = vector.load %arg4[%c0_26, %c768_27] : memref<2x1024xf32, #tpu.memory_space<vmem>>, vector<2x256xf32>
    tpu.vector_store %arg4[%c0_26, %c768_27], %147 {strides = array<i32>} : memref<2x1024xf32, #tpu.memory_space<vmem>>, vector<2x256xf32>,
    return
  }
  func.func @transform_0(%arg0: i32) -> (i32, i32) {
    %c0_i32 = arith.constant 0 : i32
    %c0_i32_0 = arith.constant 0 : i32
    return %arg0, %c0_i32 : i32, i32
  }
  func.func @transform_1(%arg0: i32) -> i32 {
    %c0_i32 = arith.constant 0 : i32
    %c0_i32_0 = arith.constant 0 : i32
    return %c0_i32 : i32
  }
  func.func @transform_2(%arg0: i32) -> (i32, i32) {
    %c0_i32 = arith.constant 0 : i32
    %c0_i32_0 = arith.constant 0 : i32
    %c0_i32_1 = arith.constant 0 : i32
    return %c0_i32, %c0_i32_0 : i32, i32
  }
  func.func @transform_3(%arg0: i32) -> (i32, i32) {
    %c0_i32 = arith.constant 0 : i32
    %c0_i32_0 = arith.constant 0 : i32
    return %arg0, %c0_i32 : i32, i32
  }
}

</mosaic_0001>

<bundles_post_ra>
// kernel: tpu_custom_call.1
= control target key start
LH: loop header
LB: loop body
LE: loop exit
PB: predicated region body
PF: predicated region fallthrough
CT: control target
= control target key end

     0   :  { %8 = vsyncpa [#allocation3], 0  ;;  %s774_s0 = inlined_call_operand.hbm [shape: f32[2,1024], index: 0, kind: input, shape index: {}]   ;;  %s775_s1 = inlined_call_operand.hbm [shape: f32[18], index: 1, kind: input, shape index: {}]   ;;  %s776_s2 = inlined_call_operand.hbm [shape: f32[3,256], index: 2, kind: input, shape index: {}]   ;;  %s777_s3 = inlined_call_operand.hbm [shape: f32[2,1024], index: 3, kind: output, shape index: {}]  }
   0x1   :  { %9 = vsyncpa [#allocation5], 0 }
   0x2   :  { %10 = vsyncpa [#allocation8], 0 }
   0x3   :  { %11 = vsyncpa [#allocation4], 0  ;;  %s574_s12 = smov [#allocation2]   ;;  %s575_s14 = smov [#allocation7]  }
   0x4   :  { %s18_s13 = sshll.u32 %s574_s12, 4  ;;  %s36_s15 = sshll.u32 %s575_s14, 4  ;;  %s19_s13 = int_to_ptr.vmem [resolvable:$true] %s18_s13  ;;  %s37_s15 = int_to_ptr.vmem [resolvable:$true] %s36_s15 }
   0x5   :  { %s490_s18 = scalar_lea.hbm %s774_s0, 256 }
   0x6   :  { %p491_p0 = scmp.ne.s32.totalorder %s774_s0, %s490_s18  ;;  %p494_p1 = scmp.lt.u32.totalorder %s490_s18, %s774_s0 }
   0x8   :  { %p496_p2 = pnand %p494_p1, %p491_p0 }
   0xa   :  { %499 = shalt.err (!%p496_p2)
}
   0xb   :  { %s500_s23 = scalar_lea.vmem %s19_s13, 256  ;;  %p505_p4 = scmp.lt.s32.totalorder %s19_s13, %s19_s13 }
   0xc   :  { %p501_p3 = scmp.ne.s32.totalorder %s19_s13, %s500_s23  ;;  %p506_p5 = scmp.lt.s32.totalorder %s500_s23, %s500_s23 }
   0xe   :  { %p507_p6 = por %p506_p5, %p505_p4 }
  0x10   :  { %p508_p7 = pnand %p507_p6, %p501_p3 }
  0x12   :  { %511 = shalt.err (!%p508_p7)
}
  0x13   :  { %21 = dma.hbm_to_vmem [thread:$0]  %s774_s0, 256, %s19_s13, [#allocation3]  }
  0x14   :  { %s512_s28 = scalar_lea.hbm %s775_s1, 16 }
  0x15   :  { %p513_p8 = scmp.ne.s32.totalorder %s775_s1, %s512_s28  ;;  %p516_p9 = scmp.lt.u32.totalorder %s512_s28, %s775_s1 }
  0x17   :  { %p518_p10 = pnand %p516_p9, %p513_p8 }
  0x19   :  { %521 = shalt.err (!%p518_p10)
}
  0x1a   :  { %s576_s6 = smov [#allocation6]   ;;  %s522_s10 = scalar_lea.hbm %s776_s2, 128 }
  0x1b   :  { %29 = dma.hbm_to_smem %s775_s1, 16, %s576_s6, [#allocation5]  }
  0x1c   :  { %p523_p11 = scmp.ne.s32.totalorder %s776_s2, %s522_s10  ;;  %p526_p12 = scmp.lt.u32.totalorder %s522_s10, %s776_s2 }
  0x1e   :  { %p528_p13 = pnand %p526_p12, %p523_p11 }
  0x20   :  { %531 = shalt.err (!%p528_p13)
}
  0x21   :  { %s532_s16 = scalar_lea.vmem %s37_s15, 128  ;;  %p537_p1 = scmp.lt.s32.totalorder %s37_s15, %s37_s15 }
  0x22   :  { %p533_p0 = scmp.ne.s32.totalorder %s37_s15, %s532_s16  ;;  %p538_p2 = scmp.lt.s32.totalorder %s532_s16, %s532_s16 }
  0x24   :  { %p539_p3 = por %p538_p2, %p537_p1 }
  0x26   :  { %p540_p4 = pnand %p539_p3, %p533_p0 }
  0x28   :  { %543 = shalt.err (!%p540_p4)
}
  0x29   :  { %39 = dma.hbm_to_vmem [thread:$0]  %s776_s2, 128, %s37_s15, [#allocation8]  }
  0x2a   :  { %566 = dma.done.wait [#allocation3], 256  }
  0x2b   :  { %567 = vsyncadd [#allocation3], 4294967040 }
  0x2c   :  { %568 = dma.done.wait [#allocation5], 16  }
  0x2d   :  { %569 = vsyncadd [#allocation5], 4294967280 }
  0x2e   :  { %570 = dma.done.wait [#allocation8], 128  }
  0x2f   :  { %571 = vsyncadd [#allocation8], 4294967168 }
  0x30   :  { %49 = sfence }
  0x31   :  { %v643_v0 = vld [vmem:[#allocation2] sm:$0xf]  ;;  %v51_v1 = vld [vmem:[#allocation2 + $0x4] sm:$0xf]  ;;  %v54_v2 = vld [vmem:[#allocation2 + $0x8] sm:$0xf]  ;;  %v61_v3 = vlaneseq }
  0x32   :  { %v52_v4 = vadd.f32 %v51_v1, %v643_v0  ;;  %v53_v5 = vmax.f32 %v643_v0, %v51_v1  ;;  %s451_s18 = sld [smem:[#allocation6 + $0x1]]  ;;  %v57_v6 = vld [vmem:[#allocation2 + $0xc] sm:$0xf]  ;;  %v577_v7 = vmov 1983009808   ;;  %s452_s2 = sld [smem:[#allocation6 + $0xa]] }
  0x33   :  { %v77_v8 = vunpack.c.l.s4 %v577_v7  ;;  %s68_s15 = sld [smem:[#allocation6]]  ;;  %s450_s19 = sld [smem:[#allocation6 + $0x9]]  ;;  %v648_v11 = vshrl.u32 %v61_v3, 7  ;;  %v661_v17 = vld [vmem:[#allocation7] sm:$0x77] }
  0x34   :  { %v55_v9 = vadd.f32 %v54_v2, %v52_v4  ;;  %v56_v10 = vmax.f32 %v53_v5, %v54_v2  ;;  %s455_s20 = sld [smem:[#allocation6 + $0x3]]  ;;  %s456_s21 = sld [smem:[#allocation6 + $0xc]] }
  0x35   :  { %v78_v14 = vunpack.c.0.s8 %v77_v8  ;;  %s654_s22 = sld [smem:[#allocation6 + $0x2]]  ;;  %s656_s23 = sld [smem:[#allocation6 + $0xb]]  ;;  %v141_v15 = vsub.s32 1, %v648_v11  ;;  %v145_v18 = vsub.s32 5, %v648_v11 }
  0x36   :  { %v650_v12 = vadd.f32 %v57_v6, %v55_v9  ;;  %v652_v13 = vmax.f32 %v56_v10, %v57_v6  ;;  %s659_s24 = sld [smem:[#allocation6 + $0x6]]  ;;  %s665_s25 = sld [smem:[#allocation6 + $0xf]] }
  0x37   :  { %v668_v21 = vsub.s32 %v78_v14, %v648_v11  ;;  %s671_s26 = sld [smem:[#allocation6 + $0x7]]  ;;  %s673_s27 = sld [smem:[#allocation6 + $0x10]]  ;;  %v142_v28 = vrot.slane %v661_v17, %v141_v15  ;;  %v146_v32 = vrot.slane %v661_v17, %v145_v18 }
  0x38   :  { %v115_v16 = vstv %s451_s18  ;;  %v118_v20 = vstv %s452_s2  ;;  %s677_s28 = sld [smem:[#allocation6 + $0x5]]  ;;  %s685_s29 = sld [smem:[#allocation6 + $0xe]] }
  0x39   :  { %v116_v19 = vmul.f32 %v115_v16, %v650_v12  ;;  %v119_v22 = vmul.f32 %v118_v20, %v652_v13  ;;  %v69_v23 = vstv %s68_s15  ;;  %v72_v24 = vstv %s450_s19  ;;  %s691_s30 = sld [smem:[#allocation6 + $0x8]]  ;;  %s697_s4 = sld [smem:[#allocation6 + $0x4]] }
  0x3a   :  { %v70_v25 = vmul.f32 %v69_v23, %v650_v12  ;;  %v73_v26 = vmul.f32 %v72_v24, %v652_v13  ;;  %v217_v27 = vstv %s455_s20  ;;  %v220_v31 = vstv %s456_s21  ;;  %s699_s5 = sld [smem:[#allocation6 + $0xd]]  ;;  %s578_s6 = smov 16  }
  0x3b   :  { %v120_v29 = vadd.f32 %v119_v22, %v116_v19  ;;  %v218_v30 = vmul.f32 %v217_v27, %v650_v12  ;;  %v221_v34 = vmul.f32 %v220_v31, %v652_v13  ;;  %v162_v35 = vstv %s654_s22  ;;  %s579_s7 = smov 17   ;;  %s709_s8 = sld [smem:[#allocation6 + $0x11]] }
  0x3c   :  { %v74_v33 = vadd.f32 %v73_v26, %v70_v25  ;;  %v165_v36 = vstv %s656_s23  ;;  %v163_v38 = vmul.f32 %v162_v35, %v650_v12  ;;  %v307_v40 = vstv %s659_s24  ;;  %s580_s0 = smov 1   ;;  %s581_s9 = smov 15  }
  0x3d   :  { %v128_v37 = vrot.slane %v120_v29, %v668_v21  ;;  %v166_v39 = vmul.f32 %v165_v36, %v652_v13  ;;  %v222_v42 = vadd.f32 %v221_v34, %v218_v30  ;;  %v310_v43 = vstv %s665_s25  ;;  %s582_s10 = smov 113   ;;  %s583_s11 = smov 112  }
  0x3e   :  { %v82_v41 = vrot.slane %v74_v33, %v668_v21  ;;  %v695_v44 = vrot.slane %v142_v28, %v141_v15  ;;  %v308_v46 = vmul.f32 %v307_v40, %v650_v12  ;;  %v311_v47 = vmul.f32 %v310_v43, %v652_v13  ;;  %s584_s12 = smov 127   ;;  %s585_s13 = smov 111  }
  0x3f   :  { %132 = vrot.lane.b32.xlu1 %v128_v37, %s578_s6  ;;  %v129_v45 = vcombine.high %v128_v37, %v128_v37  ;;  %v703_v48 = vrot.slane %v146_v32, %v141_v15  ;;  %v230_v49 = vrot.slane %v222_v42, %v668_v21  ;;  %v167_v50 = vadd.f32 %v166_v39, %v163_v38  ;;  %s586_s14 = smov [#allocation9]  }
  0x40   :  { %86 = vrot.lane.b32.xlu0 %v82_v41, %s579_s7  ;;  %v334_v51 = vstv %s671_s26  ;;  %v337_v52 = vstv %s673_s27  ;;  %v276_v53 = vstv %s677_s28  ;;  %v312_v55 = vadd.f32 %v311_v47, %v308_v46  ;;  %s439_s16 = sshll.u32 %s586_s14, 4  ;;  %s440_s16 = int_to_ptr.vmem [resolvable:$true] %s439_s16 }
  0x41   :  { %v231_v54 = vcombine.high %v230_v49, %v230_v49  ;;  %v335_v56 = vmul.f32 %v334_v51, %v650_v12  ;;  %v338_v57 = vmul.f32 %v337_v52, %v652_v13  ;;  %v175_v58 = vrot.slane %v167_v50, %v668_v21  ;;  %s544_s1 = scalar_lea.vmem %s440_s16, 256  ;;  %p549_p6 = scmp.lt.s32.totalorder %s440_s16, %s440_s16 }
  0x42   :  { %v279_v59 = vstv %s685_s29  ;;  %v252_v60 = vcombine.low %v695_v44, %v703_v48  ;;  %v277_v61 = vmul.f32 %v276_v53, %v650_v12  ;;  %v363_v63 = vstv %s691_s30  ;;  %p545_p5 = scmp.ne.s32.totalorder %s440_s16, %s544_s1  ;;  %p550_p7 = scmp.lt.s32.totalorder %s544_s1, %s544_s1 }
  0x43   :  { %134 = vrot.lane.b32.xlu1 %v129_v45, %s578_s6  ;;  %v176_v62 = vcombine.high %v175_v58, %v175_v58  ;;  %v244_v1 = vstv %s697_s4  ;;  %v247_v2 = vstv %s699_s5  ;;  %v320_v4 = vrot.slane %v312_v55, %v668_v21 }
  0x44   :  { %234 = vrot.lane.b32.xlu0 %v230_v49, %s580_s0  ;;  %v339_v5 = vadd.f32 %v338_v57, %v335_v56  ;;  %v280_v6 = vmul.f32 %v279_v59, %v652_v13  ;;  %v245_v7 = vmul.f32 %v244_v1, %v650_v12  ;;  %v83_v8 = vcombine.high %v82_v41, %v82_v41  ;;  %p551_p8 = por %p550_p7, %p549_p6 }
  0x45   :  { %v366_v9 = vstv %s709_s8  ;;  %v248_v10 = vmul.f32 %v247_v2, %v652_v13  ;;  %v259_v14 = vrot.slane %v252_v60, %v668_v21  ;;  %v364_v15 = vmul.f32 %v363_v63, %v650_v12 }
  0x46   :  { %v321_v18 = vcombine.high %v320_v4, %v320_v4  ;;  %v347_v19 = vrot.slane %v339_v5, %v668_v21  ;;  %v281_v20 = vadd.f32 %v280_v6, %v277_v61  ;;  %v367_v22 = vmul.f32 %v366_v9, %v652_v13  ;;  %p552_p9 = pnand %p551_p8, %p545_p5 }
  0x47   :  { %236 = vrot.lane.b32.xlu1 %v231_v54, %s580_s0  ;;  %v249_v16 = vadd.f32 %v248_v10, %v245_v7  ;;  %v96_v13 = vsub.s32 0, %v648_v11  ;;  %v100_v29 = vsub.s32 4, %v648_v11  ;;  %v737_v30 = vand.u32 127, %v61_v3 }
  0x48   :  { %179 = vrot.lane.b32.xlu0 %v175_v58, %s581_s9  ;;  %v348_v24 = vcombine.high %v347_v19, %v347_v19  ;;  %v289_v25 = vrot.slane %v281_v20, %v668_v21  ;;  %v368_v26 = vadd.f32 %v367_v22, %v364_v15  ;;  %v188_v35 = vsub.s32 2, %v648_v11 }
  0x49   :  { %v261_v23 = vmul.f32 %v259_v14, %v249_v16  ;;  %v97_v33 = vrot.slane %v661_v17, %v96_v13  ;;  %v101_v34 = vrot.slane %v661_v17, %v100_v29  ;;  %vm136_vm0 = vcmp.lt.s32.totalorder %v737_v30, 16 }
  0x4a   :  { %v290_v12 = vcombine.high %v289_v25, %v289_v25  ;;  %v376_v27 = vrot.slane %v368_v26, %v668_v21  ;;  %v192_v36 = vsub.s32 6, %v648_v11  ;;  %vm238_vm1 = vcmp.lt.s32.totalorder %v737_v30, 1 }
  0x4b   :  { %181 = vrot.lane.b32.xlu1 %v176_v62, %s581_s9  ;;  %v269_v38 = vrot.slane %v261_v23, %v668_v21  ;;  %v107_v41 = vrot.slane %v97_v33, %v96_v13  ;;  %v111_v42 = vrot.slane %v101_v34, %v96_v13  ;;  %v189_v46 = vrot.slane %v661_v17, %v188_v35 }
  0x4c   :  { %88 = vrot.lane.b32.xlu0 %v83_v8, %s579_s7  ;;  %v377_v28 = vcombine.high %v376_v27, %v376_v27  ;;  %v193_v47 = vrot.slane %v661_v17, %v192_v36  ;;  %vm183_vm2 = vcmp.lt.s32.totalorder %v737_v30, 15  ;;  %vm90_vm3 = vcmp.lt.s32.totalorder %v737_v30, 17 }
  0x4d   :  { %v270_v49 = vcombine.high %v269_v38, %v269_v38  ;;  %v199_v55 = vrot.slane %v189_v46, %v188_v35  ;;  %vm328_vm4 = vcmp.lt.s32.totalorder %v737_v30, 113  ;;  %vm355_vm5 = vcmp.lt.s32.totalorder %v737_v30, 112 }
  0x4e   :  { %v203_v56 = vrot.slane %v193_v47, %v188_v35  ;;  %vm64_vm6 = vcmp.ge.s32.totalorder %v737_v30, 16  ;;  %vm297_vm7 = vcmp.lt.s32.totalorder %v737_v30, 127  ;;  %vm384_vm8 = vcmp.lt.s32.totalorder %v737_v30, 111 }
  0x4f   :  { %326 = vrot.lane.b32.xlu1 %v321_v18, %s582_s10  ;;  %v63_v36 = vadd.s32 128, %v737_v30 }
  0x50   :  { %324 = vrot.lane.b32.xlu0 %v320_v4, %s582_s10 }
  0x51   :  { %vm67_vm9 = vcmp.lt.s32.totalorder %v63_v36, 240 }
  0x53   :  { %353 = vrot.lane.b32.xlu1 %v348_v24, %s583_s11 }
  0x54   :  { %351 = vrot.lane.b32.xlu0 %v347_v19, %s583_s11 }
  0x57   :  { %295 = vrot.lane.b32.xlu1 %v290_v12, %s584_s12 }
  0x58   :  { %293 = vrot.lane.b32.xlu0 %v289_v25, %s584_s12 }
  0x5b   :  { %382 = vrot.lane.b32.xlu1 %v377_v28, %s585_s13 }
  0x5c   :  { %380 = vrot.lane.b32.xlu0 %v376_v27, %s585_s13 }
  0xb1   :  { %v133_v31 = vpop.permute.xlu1 %132 }
  0xb2   :  { %v87_v32 = vpop.permute.xlu0 %86 }
  0xb5   :  { %v135_v37 = vpop.permute.xlu1 %134 }
  0xb6   :  { %v137_v39 = vsel %vm136_vm0, %v133_v31, %v135_v37  ;;  %v138_v3 = vsel %vm136_vm0, %v135_v37, %v133_v31  ;;  %v235_v40 = vpop.permute.xlu0 %234 }
  0xb7   :  { %v157_v43 = vmul.f32 %v695_v44, %v138_v3  ;;  %v158_v45 = vmul.f32 %v703_v48, %v137_v39 }
  0xb9   :  { %v237_v11 = vpop.permute.xlu1 %236 }
  0xba   :  { %v239_v50 = vsel %vm238_vm1, %v235_v40, %v237_v11  ;;  %v240_v51 = vsel %vm238_vm1, %v237_v11, %v235_v40  ;;  %v180_v52 = vpop.permute.xlu0 %179 }
  0xbb   :  { %v241_v53 = vmul.f32 %v240_v51, %v107_v41  ;;  %v242_v54 = vmul.f32 %v239_v50, %v111_v42 }
  0xbd   :  { %v273_v57 = vadd.f32 %v269_v38, %v241_v53  ;;  %v274_v58 = vadd.f32 %v270_v49, %v242_v54  ;;  %v182_v59 = vpop.permute.xlu1 %181 }
  0xbe   :  { %v184_v60 = vsel %vm183_vm2, %v180_v52, %v182_v59  ;;  %v185_v61 = vsel %vm183_vm2, %v182_v59, %v180_v52  ;;  %v89_v62 = vpop.permute.xlu0 %88  ;;  %v430_v59 = vld [vmem:[#allocation2 + $0xc] sm:$0xf] }
  0xbf   :  { %v204_v17 = vmul.f32 %v199_v55, %v185_v61  ;;  %v205_v63 = vmul.f32 %v203_v56, %v184_v60  ;;  %v91_v1 = vsel %vm90_vm3, %v87_v32, %v89_v62  ;;  %v92_v2 = vsel %vm90_vm3, %v89_v62, %v87_v32 }
  0xc0   :  { %v112_v4 = vmul.f32 %v107_v41, %v92_v2  ;;  %v113_v5 = vmul.f32 %v111_v42, %v91_v1 }
  0xc1   :  { %v327_v6 = vpop.permute.xlu1 %326 }
  0xc2   :  { %v159_v7 = vadd.f32 %v157_v43, %v112_v4  ;;  %v160_v8 = vadd.f32 %v158_v45, %v113_v5  ;;  %v325_v9 = vpop.permute.xlu0 %324 }
  0xc3   :  { %v329_v10 = vsel %vm328_vm4, %v325_v9, %v327_v6  ;;  %v330_v14 = vsel %vm328_vm4, %v327_v6, %v325_v9 }
  0xc4   :  { %v206_v15 = vadd.f32 %v204_v17, %v159_v7  ;;  %v207_v16 = vadd.f32 %v205_v63, %v160_v8  ;;  %v331_v18 = vmul.f32 %v329_v10, %v107_v41  ;;  %v332_v19 = vmul.f32 %v330_v14, %v111_v42 }
  0xc5   :  { %v354_v20 = vpop.permute.xlu1 %353 }
  0xc6   :  { %v352_v22 = vpop.permute.xlu0 %351  ;;  %v212_v23 = vsel %vm64_vm6, %v206_v15, 0.0 }
  0xc7   :  { %v356_v24 = vsel %vm355_vm5, %v352_v22, %v354_v20  ;;  %v357_v25 = vsel %vm355_vm5, %v354_v20, %v352_v22 }
  0xc8   :  { %v358_v26 = vmul.f32 %v356_v24, %v695_v44  ;;  %v359_v12 = vmul.f32 %v357_v25, %v703_v48 }
  0xc9   :  { %v296_v27 = vpop.permute.xlu1 %295 }
  0xca   :  { %v360_v28 = vadd.f32 %v358_v26, %v331_v18  ;;  %v361_v13 = vadd.f32 %v359_v12, %v332_v19  ;;  %v294_v29 = vpop.permute.xlu0 %293 }
  0xcb   :  { %v298_v31 = vsel %vm297_vm7, %v294_v29, %v296_v27  ;;  %v299_v32 = vsel %vm297_vm7, %v296_v27, %v294_v29 }
  0xcc   :  { %v300_v33 = vmul.f32 %v298_v31, %v199_v55  ;;  %v301_v34 = vmul.f32 %v299_v32, %v203_v56 }
  0xcd   :  { %v383_v35 = vpop.permute.xlu1 %382 }
  0xce   :  { %v302_v37 = vadd.f32 %v300_v33, %v273_v57  ;;  %v303_v38 = vadd.f32 %v301_v34, %v274_v58  ;;  %v381_v44 = vpop.permute.xlu0 %380  ;;  %v427_v58 = vld [vmem:[#allocation2 + $0x8] sm:$0xf] }
  0xcf   :  { %v385_v39 = vsel %vm384_vm8, %v381_v44, %v383_v35  ;;  %v386_v48 = vsel %vm384_vm8, %v383_v35, %v381_v44 }
  0xd0   :  { %v304_v3 = vadd.f32 %v302_v37, %v212_v23  ;;  %v305_v40 = vadd.f32 %v303_v38, %v207_v16  ;;  %v387_v41 = vmul.f32 %v385_v39, %v199_v55  ;;  %v388_v42 = vmul.f32 %v386_v48, %v203_v56  ;;  %v424_v56 = vld [vmem:[#allocation2 + $0x4] sm:$0xf] }
  0xd2   :  { %v389_v43 = vadd.f32 %v387_v41, %v360_v28  ;;  %v390_v45 = vadd.f32 %v388_v42, %v361_v13 }
  0xd4   :  { %v396_v46 = vsel %vm67_vm9, %v390_v45, 0.0  ;;  %v397_v47 = vadd.f32 %v389_v43, %v304_v3 }
  0xd5   :  { %v398_v49 = vadd.f32 %v396_v46, %v305_v40 }
  0xd6   :  { %v467_v11 = vmul.f32 -1.442695, %v397_v47 }
  0xd7   :  { %v468_v50 = vmul.f32 -1.442695, %v398_v49 }
  0xd8   :  { %482 = vpow2.f32 %v467_v11 }
  0xd9   :  { %484 = vpow2.f32 %v468_v50 }
  0xe2   :  { %v483_v30 = vpop.eup %482 }
  0xe3   :  { %v485_v51 = vpop.eup %484  ;;  %v405_v52 = vadd.f32 1.0, %v483_v30 }
  0xe4   :  { %v406_v53 = vadd.f32 1.0, %v485_v51 }
  0xe5   :  { %486 = vrcp.f32 %v405_v52 }
  0xe6   :  { %488 = vrcp.f32 %v406_v53 }
  0xef   :  { %v487_v54 = vpop.eup %486 }
  0xf0   :  { %v489_v57 = vpop.eup %488 }
  0xf1   :  { %v413_v55 = vcombine.low %v487_v54, %v489_v57 }
  0xf3   :  { %v420_v60 = vrot.slane %v413_v55, %v668_v21 }
  0xf5   :  { %v422_v61 = vmul.f32 %v420_v60, %v643_v0  ;;  %v425_v62 = vmul.f32 %v424_v56, %v420_v60  ;;  %v428_v17 = vmul.f32 %v427_v58, %v420_v60  ;;  %v431_v63 = vmul.f32 %v430_v59, %v420_v60 }
  0xf7   :  { %423 = vst [vmem:[#allocation9] sm:$0xf] %v422_v61  ;;  %426 = vst [vmem:[#allocation9 + $0x4] sm:$0xf] %v425_v62 }
  0xf8   :  { %429 = vst [vmem:[#allocation9 + $0x8] sm:$0xf] %v428_v17  ;;  %432 = vst [vmem:[#allocation9 + $0xc] sm:$0xf] %v431_v63 }
  0xf9   :  { %555 = shalt.err (!%p552_p9)
}
  0xfa   :  { %s556_s2 = scalar_lea.hbm %s777_s3, 256 }
  0xfb   :  { %p557_p10 = scmp.ne.s32.totalorder %s777_s3, %s556_s2  ;;  %p560_p11 = scmp.lt.u32.totalorder %s556_s2, %s777_s3 }
  0xfd   :  { %p562_p12 = pnand %p560_p11, %p557_p10 }
  0xff   :  { %565 = shalt.err (!%p562_p12)
}
 0x100   :  { %442 = dma.vmem_to_hbm [thread:$0]  %s440_s16, 256, %s777_s3, [#allocation4]  }
 0x101   :  { %572 = dma.done.wait [#allocation4], 256  }
 0x102   :  { %573 = vsyncadd [#allocation4], 4294967040 }
 0x103   :  { %446 = vsyncpa [#allocation3], 1 }
 0x104   :  { %447 = vsyncpa [#allocation8], 1 }
 0x105   :  { %448 = vsyncpa [#allocation4], 1 }
 0x106   :  { %449 = vsyncpa [#allocation5], 1 }

</bundles_post_ra>
